<compile_context>
chip_gen: v7x
topology: tpu7x:2x2x1
jax: 0.10.0
libtpu: 0.0.40
codegen_flags: <defaults>
</compile_context>

<pallas_src>
import functools

import jax
import jax.numpy as jnp
from jax.experimental import pallas as pl
from jax.experimental.pallas import tpu as pltpu

_LANES = 128

# torch F.pad mode -> jnp.pad mode
_PAD_MODE_MAP = {
    "reflect": "reflect",
    "replicate": "edge",
    "constant": "constant",
    "circular": "wrap",
}


def _causal_conv1d_kernel(x_ref, w_ref, b_ref, o_ref, *, k_size, dilation):
    # x_ref: (C_in, causal_pad + T_out_pad)   one batch element
    # w_ref: (K, C_out, C_in)                 f32, per-tap (C_out, C_in) matrices
    # b_ref: (C_out, 1)                       f32
    # o_ref: (C_out, T_out_pad)
    t_out = o_ref.shape[-1]
    # Fuse the bias add into the accumulator init.
    acc = jnp.broadcast_to(b_ref[...], o_ref.shape).astype(jnp.float32)
    for k in range(k_size):                       # static unroll over taps
        start = k * dilation                      # static lane offset
        x_k = x_ref[:, start:start + t_out]       # (C_in, T_out_pad), static slice
        acc = acc + jnp.dot(
            w_ref[k], x_k,
            preferred_element_type=jnp.float32,
            precision=jax.lax.Precision.HIGHEST,
        )
    o_ref[...] = acc.astype(o_ref.dtype)


def causal_conv1d_pallas(x, weight, bias, *, dilation=1, stride=1,
                         pad_mode="reflect"):
    """Causal 1-D convolution, matching CausalConv1d.forward.

    x:      (B, C_in, T)
    weight: (C_out, C_in, K)
    bias:   (C_out,)
    """
    assert stride == 1, "stride != 1 not implemented"  # TODO(synk)
    B, C_in, T = x.shape
    C_out, C_in_w, K = weight.shape
    assert C_in_w == C_in

    causal_pad = dilation * (K - 1) + (1 - stride)

    # Left-only causal padding (tiny: dilation*(K-1) elements) in the wrapper.
    xp = x
    if causal_pad > 0:
        xp = jnp.pad(xp, ((0, 0), (0, 0), (causal_pad, 0)),
                     mode=_PAD_MODE_MAP[pad_mode])

    # Round the output time axis up to a multiple of 128 lanes so stores are
    # unmasked; zero-pad the input on the right to cover the extra columns
    # (their outputs are sliced off below, so the fill value is irrelevant).
    T_out = T  # stride == 1
    T_out_pad = pl.cdiv(T_out, _LANES) * _LANES
    extra = (T_out_pad + causal_pad) - xp.shape[-1]
    if extra > 0:
        xp = jnp.pad(xp, ((0, 0), (0, 0), (0, extra)))
    T_in = xp.shape[-1]

    # Per-tap weight matrices: (K, C_out, C_in), so w_ref[k] is a contiguous
    # (C_out, C_in) tile inside the kernel.
    w_t = jnp.transpose(weight.astype(jnp.float32), (2, 0, 1))
    b2 = bias.astype(jnp.float32).reshape(C_out, 1)

    kernel = functools.partial(_causal_conv1d_kernel,
                               k_size=K, dilation=dilation)

    out = pl.pallas_call(
        kernel,
        out_shape=jax.ShapeDtypeStruct((B, C_out, T_out_pad), x.dtype),
        grid=(B,),
        in_specs=[
            pl.BlockSpec((None, C_in, T_in), lambda b: (b, 0, 0)),   # x (per batch)
            pl.BlockSpec((K, C_out, C_in), lambda b: (0, 0, 0)),     # weights (resident)
            pl.BlockSpec((C_out, 1), lambda b: (0, 0)),              # bias (resident)
        ],
        out_specs=pl.BlockSpec((None, C_out, T_out_pad), lambda b: (b, 0, 0)),
        compiler_params=pltpu.CompilerParams(
            dimension_semantics=("parallel",),
            vmem_limit_bytes=32 * 1024 * 1024,
        ),
    )(xp, w_t, b2)

    if T_out_pad != T_out:
        out = out[:, :, :T_out]
    return out


def _causal_conv1d_ref(x, weight, bias, *, dilation=1, stride=1,
                       pad_mode="reflect"):
    K = weight.shape[-1]
    causal_pad = dilation * (K - 1) + (1 - stride)
    xp = jnp.pad(x, ((0, 0), (0, 0), (causal_pad, 0)),
                 mode=_PAD_MODE_MAP[pad_mode])
    out = jax.lax.conv_general_dilated(
        xp, weight,
        window_strides=(stride,),
        padding="VALID",
        rhs_dilation=(dilation,),
        dimension_numbers=("NCH", "OIH", "NCH"),
        precision=jax.lax.Precision.HIGHEST,
    )
    return out + bias[None, :, None]


if __name__ == "__main__":
    key = jax.random.PRNGKey(0)
    kx, kw, kb, kx2, kw2, kb2 = jax.random.split(key, 6)

    # Config 1: module defaults (kernel_size=3, dilation=1, stride=1, reflect).
    B, Cin, Cout, T, K = 2, 4, 8, 16, 3
    x = jax.random.normal(kx, (B, Cin, T), dtype=jnp.float32)
    w = jax.random.normal(kw, (Cout, Cin, K), dtype=jnp.float32) * 0.2
    b = jax.random.normal(kb, (Cout,), dtype=jnp.float32)

    fwd = jax.jit(functools.partial(causal_conv1d_pallas,
                                    dilation=1, pad_mode="reflect"))
    out = jax.block_until_ready(fwd(x, w, b))
    ref = _causal_conv1d_ref(x, w, b, dilation=1, pad_mode="reflect")
    assert out.shape == ref.shape == (B, Cout, T)
    assert jnp.allclose(out, ref, atol=5e-3, rtol=5e-3), \
        float(jnp.max(jnp.abs(out - ref)))

    # Config 2: dilated kernel + non-lane-aligned length (exercises pad glue).
    B2, Cin2, Cout2, T2, K2, dil2 = 2, 4, 6, 300, 5, 2
    x2 = jax.random.normal(kx2, (B2, Cin2, T2), dtype=jnp.float32)
    w2 = jax.random.normal(kw2, (Cout2, Cin2, K2), dtype=jnp.float32) * 0.2
    b2 = jax.random.normal(kb2, (Cout2,), dtype=jnp.float32)
    out2 = jax.block_until_ready(
        causal_conv1d_pallas(x2, w2, b2, dilation=dil2, pad_mode="reflect"))
    ref2 = _causal_conv1d_ref(x2, w2, b2, dilation=dil2, pad_mode="reflect")
    assert out2.shape == ref2.shape == (B2, Cout2, T2)
    assert jnp.allclose(out2, ref2, atol=5e-3, rtol=5e-3), \
        float(jnp.max(jnp.abs(out2 - ref2)))

    print("KERNEL_OK")
</pallas_src>

<mosaic_0001>
module attributes {stable_mosaic.version = 11 : i64} {
  func.func @_causal_conv1d_kernel(%arg0: i32, %arg1: memref<1x4x130xf32, #tpu.memory_space<vmem>>, %arg2: memref<3x8x4xf32, #tpu.memory_space<vmem>>, %arg3: memref<8x1xf32, #tpu.memory_space<vmem>>, %arg4: memref<1x8x128xf32, #tpu.memory_space<vmem>>) attributes {dimension_semantics = [#tpu.dimension_semantics<parallel>], iteration_bounds = array<i64: 2>, scalar_prefetch = 0 : i64, scratch_operands = 0 : i64, tpu.core_type = #tpu.core_type<tc>, window_params = [{transform_indices = @transform_0, window_bounds = array<i64: 1, 4, 130>}, {pipeline_mode = #tpu.pipeline_mode<synchronous>, transform_indices = @transform_1, window_bounds = array<i64: 3, 8, 4>}, {pipeline_mode = #tpu.pipeline_mode<synchronous>, transform_indices = @transform_2, window_bounds = array<i64: 8, 1>}, {transform_indices = @transform_3, window_bounds = array<i64: 1, 8, 128>}]} {
    %c0 = arith.constant 0 : index
    %c0_0 = arith.constant 0 : index
    %0 = vector.load %arg3[%c0, %c0_0] : memref<8x1xf32, #tpu.memory_space<vmem>>, vector<8x1xf32>
    %1 = vector.shape_cast %0 : vector<8x1xf32> to vector<8x1xf32>
    %2 = vector.broadcast %1 : vector<8x1xf32> to vector<8x128xf32>
    %c0_1 = arith.constant 0 : index
    %c0_2 = arith.constant 0 : index
    %c0_3 = arith.constant 0 : index
    %3 = vector.load %arg1[%c0_1, %c0_2, %c0_3] : memref<1x4x130xf32, #tpu.memory_space<vmem>>, vector<1x4x128xf32>
    %4 = vector.shape_cast %3 : vector<1x4x128xf32> to vector<4x128xf32>
    %c0_4 = arith.constant 0 : index
    %c0_5 = arith.constant 0 : index
    %c0_6 = arith.constant 0 : index
    %5 = vector.load %arg2[%c0_4, %c0_5, %c0_6] : memref<3x8x4xf32, #tpu.memory_space<vmem>>, vector<1x8x4xf32>
    %6 = vector.shape_cast %5 : vector<1x8x4xf32> to vector<8x4xf32>
    %cst = arith.constant dense<0.000000e+00> : vector<8x128xf32>
    %7 = tpu.matmul %6, %4, %cst {dimension_numbers = #tpu.dot_dimension_numbers<[1], [0], [0], [1], [0, 0, 1, 1], [], []>, precision = #tpu.contract_precision<fp32>} : vector<8x4xf32>, vector<4x128xf32>, vector<8x128xf32> -> vector<8x128xf32>
    %8 = arith.addf %2, %7 : vector<8x128xf32>
    %c0_7 = arith.constant 0 : index
    %c0_8 = arith.constant 0 : index
    %c1 = arith.constant 1 : index
    %9 = vector.load %arg1[%c0_7, %c0_8, %c1] : memref<1x4x130xf32, #tpu.memory_space<vmem>>, vector<1x4x128xf32>
    %10 = vector.shape_cast %9 : vector<1x4x128xf32> to vector<4x128xf32>
    %c1_9 = arith.constant 1 : index
    %c0_10 = arith.constant 0 : index
    %c0_11 = arith.constant 0 : index
    %11 = vector.load %arg2[%c1_9, %c0_10, %c0_11] : memref<3x8x4xf32, #tpu.memory_space<vmem>>, vector<1x8x4xf32>
    %12 = vector.shape_cast %11 : vector<1x8x4xf32> to vector<8x4xf32>
    %cst_12 = arith.constant dense<0.000000e+00> : vector<8x128xf32>
    %13 = tpu.matmul %12, %10, %cst_12 {dimension_numbers = #tpu.dot_dimension_numbers<[1], [0], [0], [1], [0, 0, 1, 1], [], []>, precision = #tpu.contract_precision<fp32>} : vector<8x4xf32>, vector<4x128xf32>, vector<8x128xf32> -> vector<8x128xf32>
    %14 = arith.addf %8, %13 : vector<8x128xf32>
    %c0_13 = arith.constant 0 : index
    %c0_14 = arith.constant 0 : index
    %c2 = arith.constant 2 : index
    %15 = vector.load %arg1[%c0_13, %c0_14, %c2] : memref<1x4x130xf32, #tpu.memory_space<vmem>>, vector<1x4x128xf32>
    %16 = vector.shape_cast %15 : vector<1x4x128xf32> to vector<4x128xf32>
    %c2_15 = arith.constant 2 : index
    %c0_16 = arith.constant 0 : index
    %c0_17 = arith.constant 0 : index
    %17 = vector.load %arg2[%c2_15, %c0_16, %c0_17] : memref<3x8x4xf32, #tpu.memory_space<vmem>>, vector<1x8x4xf32>
    %18 = vector.shape_cast %17 : vector<1x8x4xf32> to vector<8x4xf32>
    %cst_18 = arith.constant dense<0.000000e+00> : vector<8x128xf32>
    %19 = tpu.matmul %18, %16, %cst_18 {dimension_numbers = #tpu.dot_dimension_numbers<[1], [0], [0], [1], [0, 0, 1, 1], [], []>, precision = #tpu.contract_precision<fp32>} : vector<8x4xf32>, vector<4x128xf32>, vector<8x128xf32> -> vector<8x128xf32>
    %20 = arith.addf %14, %19 : vector<8x128xf32>
    %c0_19 = arith.constant 0 : index
    %c0_20 = arith.constant 0 : index
    %c0_21 = arith.constant 0 : index
    %21 = vector.load %arg4[%c0_19, %c0_20, %c0_21] : memref<1x8x128xf32, #tpu.memory_space<vmem>>, vector<1x8x128xf32>
    %22 = vector.shape_cast %21 : vector<1x8x128xf32> to vector<8x128xf32>
    %23 = vector.shape_cast %20 : vector<8x128xf32> to vector<1x8x128xf32>
    tpu.vector_store %arg4[%c0_19, %c0_20, %c0_21], %23 {strides = array<i32>} : memref<1x8x128xf32, #tpu.memory_space<vmem>>, vector<1x8x128xf32>,
    return
  }
  func.func @transform_0(%arg0: i32) -> (i32, i32, i32) {
    %c0_i32 = arith.constant 0 : i32
    %c0_i32_0 = arith.constant 0 : i32
    %c0_i32_1 = arith.constant 0 : i32
    return %arg0, %c0_i32, %c0_i32_0 : i32, i32, i32
  }
  func.func @transform_1(%arg0: i32) -> (i32, i32, i32) {
    %c0_i32 = arith.constant 0 : i32
    %c0_i32_0 = arith.constant 0 : i32
    %c0_i32_1 = arith.constant 0 : i32
    %c0_i32_2 = arith.constant 0 : i32
    return %c0_i32, %c0_i32_0, %c0_i32_1 : i32, i32, i32
  }
  func.func @transform_2(%arg0: i32) -> (i32, i32) {
    %c0_i32 = arith.constant 0 : i32
    %c0_i32_0 = arith.constant 0 : i32
    %c0_i32_1 = arith.constant 0 : i32
    return %c0_i32, %c0_i32_0 : i32, i32
  }
  func.func @transform_3(%arg0: i32) -> (i32, i32, i32) {
    %c0_i32 = arith.constant 0 : i32
    %c0_i32_0 = arith.constant 0 : i32
    %c0_i32_1 = arith.constant 0 : i32
    return %arg0, %c0_i32, %c0_i32_0 : i32, i32, i32
  }
}

</mosaic_0001>

<bundles_post_ra>
// kernel: causal_conv1d_pallas.1
= control target key start
LH: loop header
LB: loop body
LE: loop exit
PB: predicated region body
PF: predicated region fallthrough
CT: control target
= control target key end

     0   :  { %8 = vsyncpa [#allocation3], 0  ;;  %s2114_s0 = inlined_call_operand.vmem [shape: f32[2,4,130], index: 0, kind: input, shape index: {}]   ;;  %s2115_s1 = inlined_call_operand.vmem [shape: f32[3,8,4], index: 1, kind: input, shape index: {}]   ;;  %s2116_s2 = inlined_call_operand.vmem [shape: f32[8,1], index: 2, kind: input, shape index: {}]   ;;  %s2117_s3 = inlined_call_operand.hbm [shape: f32[2,8,128], index: 3, kind: output, shape index: {}]  }
   0x1   :  { %10 = vsyncpa [#allocation3 + $0x1], 0  ;;  %s1942_s12 = smov 0   ;;  %s1944_s13 = smov 0  }
   0x2   :  { %s1946_s14 = smov 0   ;;  %s1948_s15 = smov 0  }
   0x3 LB: > { %s1963_s16 = sadd.s32 4294967295, %s1914_s15   ;;  %s1632_s17 = sadd.s32 4294967294, %s1914_s15   ;;  %s1914_s15 = sphi %s1948_s15, %s2123_s15   ;;  %s1910_s14 = sphi %s1946_s14, %s2122_s14   ;;  %s1906_s13 = sphi %s1944_s13, %s2121_s13   ;;  %s1902_s12 = sphi %s1942_s12, %s2120_s12  }
   0x4   : > { %s1967_s18 = sadd.s32 1, %s1914_s15   ;;  %s91_s19 = sadd.s32 1, %s1910_s14 }
   0x5   : > { %s88_s20 = ssub.s32 %s1914_s15, %s1967_s18  ;;  %p101_p0 = scmp.ne.s32.totalorder %s1910_s14, %s1906_s13 }
   0x6   : > { %p89_p1 = scmp.eq.s32.totalorder %s88_s20, 0  ;;  %p102_p2 = scmp.eq.s32.totalorder %s1963_s16, 1 }
   0x7   : > { %p107_p3 = scmp.ne.s32.totalorder %s1906_s13, %s1902_s12  ;;  %p108_p4 = scmp.eq.s32.totalorder %s1632_s17, 1 }
   0x8   : > { %s1978_s21 = scalar_select %p89_p1, %s1910_s14, %s91_s19  }
   0x9   : > { %p1980_p5 = por %p102_p2, %p101_p0  ;;  %p1984_p6 = por %p108_p4, %p107_p3 }
   0xa   : > { %p1635_p7 = scmp.ge.s32.totalorder %s1914_s15, 1  ;;  %p140_p8 = scmp.lt.s32.totalorder %s1914_s15, 3 }
   0xc   : > { %p141_p9 = pnand %p1635_p7, %p140_p8 }
   0xd   : > { %p164_p10 = scmp.lt.s32.totalorder (!%p141_p9), %s1963_s16, 1  ;;  %v176_v0 = vld [vmem:[%s2115_s1] sm:$0xff] (!%p141_p9)  ;;  %v1916_v1 = vmov (!%p141_p9), 0.0   ;;  %vm1917_vm0 = vmmov (!%p141_p9), 0   ;;  %vm177_vm1 = vcmask (!%p141_p9), 31744   ;;  %vm181_vm2 = vcmask (!%p141_p9), 1043456  }
   0xe   : > { %144 = sbr.rel (%p141_p9) target bundleno = 443 (0x1bb), region = 32  ;;  %1682 = vmatprep.subr.mxu1 (!%p141_p9), %v1916_v1  ;;  %1684 = vmatprep.mubr.msk.f32.mxu1 (!%p141_p9), %vm1917_vm0, %v1916_v1  ;;  %v179_v2 = vsel (!%p141_p9), %vm177_vm1, %v176_v0, 0  ;;  %s1918_s4 = smov (!%p141_p9), 127   ;;  %v169_v17 = vld [vmem:[%s2116_s2] sm:$0xff] (!%p141_p9)  ;;  %v1920_v18 = vmov (!%p141_p9), 0   ;;  %v1639_v19 = vld [vmem:[%s2115_s1 + $0x8] sm:$0xff] (!%p141_p9) }
   0xf   : > { %1727 = vmatprep.subr.mxu0 (!%p141_p9), %v1916_v1  ;;  %1729 = vmatprep.mubr.msk.f32.mxu0 (!%p141_p9), %vm1917_vm0, %v1916_v1  ;;  %v251_v3 = vand.u32 (!%p141_p9), 4294901760, %v179_v2  ;;  %s1919_s5 = smov (!%p141_p9), 126   ;;  %v644_v20 = vsel (!%p141_p9), %vm177_vm1, %v1639_v19, 0  ;;  %vm641_vm3 = vcmask (!%p141_p9), 1039360   ;;  %vm1104_vm4 = vcmask (!%p141_p9), 1031168   ;;  %v1640_v34 = vld [vmem:[%s2115_s1 + $0x10] sm:$0xff] (!%p141_p9) }
  0x10   : > { %1850 = vset.pattern.permute.xlu0 (!%p141_p9), %v1920_v18  ;;  %v714_v21 = vand.u32 (!%p141_p9), 4294901760, %v644_v20  ;;  %v1107_v37 = vsel (!%p141_p9), %vm177_vm1, %v1640_v34, 0  ;;  %s161_s17 = sand.u32 (!%p141_p9), 1, %s1906_s13   ;;  %s1642_s20 = sshll.u32 (!%p141_p9), %s1963_s16, 7 }
  0x11   : > { %v252_v4 = vsub.f32 (!%p141_p9), %v179_v2, %v251_v3  ;;  %v1177_v41 = vand.u32 (!%p141_p9), 4294901760, %v1107_v37  ;;  %s1636_s19 = sshll.u32 (!%p141_p9), %s161_s17, 3  ;;  %s2072_s28 = scalar_lea.hbm (!%p141_p9), %s2117_s3, %s1642_s20 }
  0x12   : > { %v715_v22 = vsub.f32 (!%p141_p9), %v644_v20, %v714_v21  ;;  %s163_s24 = scalar_lea.vmem (!%p141_p9), [#allocation2], %s1636_s19  ;;  %s1560_s29 = scalar_lea.sflag (!%p141_p9), [#allocation3], %s161_s17 }
  0x13   : > { %v253_v9 = vand.u32 (!%p141_p9), 4294901760, %v252_v4  ;;  %v1178_v43 = vsub.f32 (!%p141_p9), %v1107_v37, %v1177_v41  ;;  %s1573_s25 = sshll.u32 (!%p141_p9), %s163_s24, 4  ;;  %s2074_s25 = int_to_ptr.vmem [resolvable:$true] %s1573_s25 }
  0x14   : > { %v716_v23 = vand.u32 (!%p141_p9), 4294901760, %v715_v22 }
  0x15   : > { %s165_s26 = scalar_select %p164_p10, %s1963_s16, 1  ;;  %v254_v11 = vsub.f32 %v252_v4, %v253_v9  ;;  %v1179_v45 = vand.u32 4294901760, %v1178_v43 }
  0x16   : > { %v717_v26 = vsub.f32 %v715_v22, %v716_v23  ;;  %s1921_s16 = smov [#allocation2]  }
  0x17   : > { %s1645_s27 = sshll.u32 %s165_s26, 3  ;;  %v255_v13 = vand.u32 4294901760, %v254_v11  ;;  %v1180_v47 = vsub.f32 %v1178_v43, %v1179_v45 }
  0x18   : > { %s168_s30 = scalar_lea.vmem %s2114_s0, %s1645_s27  ;;  %v718_v30 = vand.u32 4294901760, %v717_v26 }
  0x19   : > { %v632_v5 = vld [vmem:[%s168_s30] sm:$0xff]  ;;  %v1181_v49 = vand.u32 4294901760, %v1180_v47 }
  0x1a   : > { %v175_v6 = vld [vmem:[%s168_s30] sm:$0xf]  ;;  %637 = vrot.lane.b32.xlu0 %v632_v5, %s1918_s4  ;;  %v636_v8 = vcombine.high %v632_v5, %v632_v5  ;;  %1100 = vrot.lane.b32.xlu1 %v632_v5, %s1919_s5  ;;  %s1852_s30 = scalar_lea.vmem %s2074_s25, 128 }
  0x1b   : > { %v183_v7 = vsel %vm181_vm2, %v175_v6, 0  ;;  %p1853_p11 = scmp.ne.s32.totalorder %s2074_s25, %s1852_s30 }
  0x1c   : > { %v186_v10 = vand.u32 4294901760, %v183_v7 }
  0x1d   : > { %p1854_p12 = pnand %p1853_p11, %p1980_p5 }
  0x1e   : > { %v263_v12 = vsub.f32 %v183_v7, %v186_v10  ;;  %1683 = vmatpush3.msra.mxu1 %v186_v10  ;;  %639 = vrot.lane.b32.xlu0 %v636_v8, %s1918_s4  ;;  %s1856_s4 = sshll.u32 %s1921_s16, 4  ;;  %s1857_s4 = int_to_ptr.vmem [resolvable:$false] %s1856_s4 }
  0x1f   : > { %1102 = vrot.lane.b32.xlu1 %v636_v8, %s1919_s5  ;;  %1687 = vmatprep.subr.mxu1 %v1916_v1  ;;  %p1855_p13 = pneg %p1854_p12  ;;  %s1858_s5 = scalar_lea.vmem %s1857_s4, 256 }
  0x20   : > { %v264_v14 = vand.u32 4294901760, %v263_v12  ;;  %1685 = vmatmul.mubr.f32.vlgmr.msra.gmra.mrb[0].mxu1 %v255_v13  ;;  %p1859_p0 = scmp.lt.s32.totalorder %s2074_s25, %s1857_s4  ;;  %p1860_p1 = scmp.lt.s32.totalorder %s1858_s5, %s1852_s30 }
  0x21   : > { %1689 = vmatprep.mubr.msk.f32.mxu1 %vm1917_vm0, %v1916_v1 }
  0x22   : > { %v265_v15 = vsub.f32 %v263_v12, %v264_v14  ;;  %172 = vperm.xlu0 %1850, %v169_v17   ;;  %p1861_p2 = por %p1860_p1, %p1859_p0 }
  0x24   : > { %v266_v16 = vand.u32 4294901760, %v265_v15  ;;  %p1862_p3 = pnand %p1861_p2, %p1855_p13 }
  0x26   : > { %1688 = vmatpush3.msra.mxu1 %v266_v16 }
  0x27   : > { %1692 = vmatprep.subr.mxu1 %v1916_v1 }
  0x28   : > { %1690 = vmatmul.mubr.f32.vlgmr.msra.gmra.mrb[0].mxu1 %v251_v3 }
  0x29   : > { %1693 = vmatpush3.msra.mxu1 %v263_v12  ;;  %1694 = vmatprep.mubr.msk.f32.mxu1 %vm1917_vm0, %v1916_v1 }
  0x2a   : > { %1697 = vmatprep.subr.mxu1 %v1916_v1 }
  0x30   : > { %1695 = vmatmul.mubr.f32.vlgmr.msra.gmra.mrb[0].mxu1 %v252_v4 }
  0x31   : > { %1698 = vmatpush3.msra.mxu1 %v186_v10  ;;  %1699 = vmatprep.mubr.msk.f32.mxu1 %vm1917_vm0, %v1916_v1 }
  0x32   : > { %1702 = vmatprep.subr.mxu1 %v1916_v1 }
  0x38   : > { %1700 = vmatmul.mubr.f32.vlgmr.msra.gmra.mrb[0].mxu1 %v253_v9 }
  0x39   : > { %1703 = vmatpush3.msra.mxu1 %v264_v14  ;;  %1704 = vmatprep.mubr.msk.f32.mxu1 %vm1917_vm0, %v1916_v1 }
  0x3a   : > { %1707 = vmatprep.subr.mxu1 %v1916_v1 }
  0x40   : > { %1705 = vmatmul.mubr.f32.vlgmr.msra.gmra.mrb[0].mxu1 %v251_v3 }
  0x41   : > { %1708 = vmatpush3.msra.mxu1 %v186_v10  ;;  %1709 = vmatprep.mubr.msk.f32.mxu1 %vm1917_vm0, %v1916_v1 }
  0x42   : > { %1712 = vmatprep.subr.mxu1 %v1916_v1 }
  0x48   : > { %1710 = vmatmul.mubr.f32.vlgmr.msra.gmra.mrb[0].mxu1 %v251_v3 }
  0x49   : > { %1714 = vmatprep.mubr.msk.f32.mxu1 %vm1917_vm0, %v1916_v1 }
  0x8c   : > { %v638_v24 = vpop.permute.xlu0 %637  ;;  %v1101_v25 = vpop.permute.xlu1 %1100 }
  0x90   : > { %v640_v27 = vpop.permute.xlu0 %639 }
  0x91   : > { %v642_v28 = vsel %vm641_vm3, %v638_v24, %v640_v27  ;;  %v1103_v32 = vpop.permute.xlu1 %1102 }
  0x92   : > { %v646_v29 = vsel %vm181_vm2, %v642_v28, 0  ;;  %v1105_v35 = vsel %vm1104_vm4, %v1101_v25, %v1103_v32 }
  0x93   : > { %v649_v31 = vand.u32 4294901760, %v646_v29  ;;  %v1109_v38 = vsel %vm181_vm2, %v1105_v35, 0 }
  0x94   : > { %v1112_v42 = vand.u32 4294901760, %v1109_v38 }
  0x95   : > { %v726_v33 = vsub.f32 %v646_v29, %v649_v31  ;;  %1713 = vmatpush3.msra.mxu1 %v649_v31  ;;  %1728 = vmatpush3.msra.mxu0 %v649_v31 }
  0x96   : > { %1715 = vmatmul.mubr.f32.vlgmr.msra.gmra.mrb[0].mxu1 %v718_v30  ;;  %1730 = vmatmul.mubr.f32.vlgmr.msra.gmra.mrb[0].mxu0 %v716_v23  ;;  %v1189_v44 = vsub.f32 %v1109_v38, %v1112_v42 }
  0x97   : > { %1732 = vmatprep.subr.mxu0 %v1916_v1  ;;  %v727_v36 = vand.u32 4294901760, %v726_v33  ;;  %1717 = vmatprep.subr.mxu1 %v1916_v1 }
  0x98   : > { %1719 = vmatprep.mubr.msk.f32.mxu1 %vm1917_vm0, %v1916_v1  ;;  %1734 = vmatprep.mubr.msk.f32.mxu0 %vm1917_vm0, %v1916_v1  ;;  %v1190_v46 = vand.u32 4294901760, %v1189_v44 }
  0x99   : > { %1733 = vmatpush3.msra.mxu0 %v727_v36  ;;  %v728_v39 = vsub.f32 %v726_v33, %v727_v36 }
  0x9a   : > { %1737 = vmatprep.subr.mxu0 %v1916_v1  ;;  %v1191_v48 = vsub.f32 %v1189_v44, %v1190_v46 }
  0x9b   : > { %v729_v40 = vand.u32 4294901760, %v728_v39 }
  0x9c   : > { %v1192_v50 = vand.u32 4294901760, %v1191_v48 }
  0x9d   : > { %1718 = vmatpush3.msra.mxu1 %v729_v40 }
  0x9e   : > { %1720 = vmatmul.mubr.f32.vlgmr.msra.gmra.mrb[0].mxu1 %v714_v21  ;;  %1722 = vmatprep.subr.mxu1 %v1916_v1 }
  0x9f   : > { %1735 = vmatmul.mubr.f32.vlgmr.msra.gmra.mrb[0].mxu0 %v714_v21  ;;  %1723 = vmatpush3.msra.mxu1 %v726_v33 }
  0xa0   : > { %1738 = vmatpush3.msra.mxu0 %v649_v31  ;;  %1724 = vmatprep.mubr.msk.f32.mxu1 %vm1917_vm0, %v1916_v1 }
  0xa1   : > { %1739 = vmatprep.mubr.msk.f32.mxu0 %vm1917_vm0, %v1916_v1  ;;  %1742 = vmatprep.subr.mxu0 %v1916_v1  ;;  %v173_v53 = vpop.permute.xlu0 %172 }
  0xa6   : > { %1725 = vmatmul.mubr.f32.vlgmr.msra.gmra.mrb[0].mxu1 %v715_v22 }
  0xa7   : > { %1740 = vmatmul.mubr.f32.vlgmr.msra.gmra.mrb[0].mxu0 %v714_v21 }
  0xa8   : > { %1743 = vmatpush3.msra.mxu0 %v1112_v42  ;;  %1744 = vmatprep.mubr.msk.f32.mxu0 %vm1917_vm0, %v1916_v1 }
  0xa9   : > { %1747 = vmatprep.subr.mxu0 %v1916_v1 }
  0xaf   : > { %1745 = vmatmul.mubr.f32.vlgmr.msra.gmra.mrb[0].mxu0 %v1181_v49 }
  0xb0   : > { %1748 = vmatpush3.msra.mxu0 %v1192_v50  ;;  %1749 = vmatprep.mubr.msk.f32.mxu0 %vm1917_vm0, %v1916_v1 }
  0xb1   : > { %1752 = vmatprep.subr.mxu0 %v1916_v1 }
  0xb7   : > { %1750 = vmatmul.mubr.f32.vlgmr.msra.gmra.mrb[0].mxu0 %v1177_v41 }
  0xb8   : > { %1753 = vmatpush3.msra.mxu0 %v1189_v44  ;;  %1754 = vmatprep.mubr.msk.f32.mxu0 %vm1917_vm0, %v1916_v1 }
  0xb9   : > { %1757 = vmatprep.subr.mxu0 %v1916_v1 }
  0xbf   : > { %1755 = vmatmul.mubr.f32.vlgmr.msra.gmra.mrb[0].mxu0 %v1178_v43 }
  0xc0   : > { %1758 = vmatpush3.msra.mxu0 %v1112_v42  ;;  %1759 = vmatprep.mubr.msk.f32.mxu0 %vm1917_vm0, %v1916_v1 }
  0xc1   : > { %1762 = vmatprep.subr.mxu0 %v1916_v1 }
  0xc7   : > { %1760 = vmatmul.mubr.f32.vlgmr.msra.gmra.mrb[0].mxu0 %v1179_v45 }
  0xc8   : > { %1763 = vmatpush3.msra.mxu0 %v1190_v46  ;;  %1764 = vmatprep.mubr.msk.f32.mxu0 %vm1917_vm0, %v1916_v1 }
  0xc9   : > { %1767 = vmatprep.subr.mxu0 %v1916_v1 }
  0xcf   : > { %1765 = vmatmul.mubr.f32.vlgmr.msra.gmra.mrb[0].mxu0 %v1177_v41 }
  0xd0   : > { %1768 = vmatpush3.msra.mxu0 %v1112_v42  ;;  %1769 = vmatprep.mubr.msk.f32.mxu0 %vm1917_vm0, %v1916_v1 }
  0xd7   : > { %1770 = vmatmul.mubr.f32.vlgmr.msra.gmra.mrb[0].mxu0 %v1177_v41 }
 0x179   : > { %v870_v51 = vpop.f32.mrb[0].mxu1 }
 0x17a   : > { %v1726_v52 = vpop.f32.mrb[1].mxu1  ;;  %v1772_v54 = vadd.f32 %v870_v51, %v173_v53 }
 0x1aa   : > { %v1553_v55 = vpop.f32.mrb[0].mxu0 }
 0x1ab   : > { %v1773_v56 = vadd.f32 %v1772_v54, %v1553_v55  ;;  %v1771_v57 = vpop.f32.mrb[1].mxu0 }
 0x1ad   : > { %1558 = vst [vmem:[%s163_s24] sm:$0xff] %v1773_v56 }
 0x1ae   : > { %1865 = shalt.err (!%p1862_p3)
}
 0x1af   : > { %s1866_s6 = scalar_lea.hbm %s2072_s28, 128  ;;  %s1870_s9 = scalar_lea.hbm %s2117_s3, 256 }
 0x1b0   : > { %p1867_p4 = scmp.ne.s32.totalorder %s2072_s28, %s1866_s6  ;;  %p1871_p9 = scmp.lt.u32.totalorder %s2072_s28, %s2117_s3 }
 0x1b1   : > { %p1872_p10 = scmp.lt.u32.totalorder %s1870_s9, %s1866_s6  ;;  %p1874_p12 = scmp.lt.u32.totalorder %s1866_s6, %s2072_s28 }
 0x1b2   : > { %p1868_p7 = pnand %p1867_p4, %p1980_p5 }
 0x1b3   : > { %p1873_p11 = por %p1872_p10, %p1871_p9 }
 0x1b4   : > { %p1869_p8 = pneg %p1868_p7 }
 0x1b5   : > { %p1875_p13 = por %p1874_p12, %p1873_p11 }
 0x1b7   : > { %p1876_p0 = pnand %p1875_p13, %p1869_p8 }
 0x1b9   : > { %1879 = shalt.err (!%p1876_p0)
}
 0x1ba   : > { %1806 = dma.vmem_to_hbm [thread:$0]  (%p1980_p5), %s2074_s25, 128, %s2072_s28, %s1560_s29  }
 0x1bb PF: > { %p1812_p1 = scmp.ge.s32.totalorder %s1914_s15, 2  ;;  %s1585_s17 = sand.u32 1, %s1902_s12  }
 0x1bc   : > { %s1586_s19 = scalar_lea.sflag [#allocation3], %s1585_s17 }
 0x1bd   : > { %p1809_p2 = pnand %p1812_p1, %p1984_p6 }
 0x1bf   : > { %1897 = dma.done.wait (!%p1809_p2), %s1586_s19, 128  }
 0x1c0   : > { %1899 = vsyncadd (!%p1809_p2), %s1586_s19, 4294967168  ;;  %p13_p3 = scmp.ge.s32.totalorder %s1967_s18, 4   ;;  %s2120_s12 = smov %s1906_s13 }
 0x1c1   : > { %s2121_s13 = smov %s1910_s14  ;;  %s2122_s14 = smov %s1978_s21 }
 0x1c2   : > { %s2123_s15 = smov %s1967_s18  ;;  %15 = sbr.rel (!%p13_p3) target bundleno = 3 (0x3), region = 69 }
 0x1c9   :  { %1591 = vsyncpa [#allocation3], 1 }
 0x1ca   :  { %1593 = vsyncpa [#allocation3 + $0x1], 1 }

</bundles_post_ra>
